<compile_context>
chip_gen: v6e
topology: v6e:2x2x1
jax: 0.10.0
libtpu: 0.0.40
codegen_flags: <defaults>
</compile_context>

<pallas_src>
import functools

import jax
import jax.numpy as jnp
from jax.experimental import pallas as pl
from jax.experimental.pallas import tpu as pltpu

_LANE = 128
_SUBLANE = 8


def _round_up(n, m):
    return (n + m - 1) // m * m


def _pad_to(a, shape):
    return jnp.pad(a, [(0, t - s) for s, t in zip(a.shape, shape)])


# --------------------------------------------------------------------------- #
# Kernel: 5 chained lane-dense matmuls (branch L1, branch L2, [branch L3
# folded with shared L1], shared L2, shared L3).  MXU operands in x_ref.dtype,
# f32 accumulation via preferred_element_type; bias-add / ReLU in f32 on VPU.
# --------------------------------------------------------------------------- #
def _shared_mlp_kernel(x_ref, w1_ref, wmid_ref, w6_ref, b_ref, out_ref):
    dt = x_ref.dtype
    b = b_ref[...]                                       # (8, 256) packed f32 biases

    # branch layer 1 + ReLU (bias folded into W1 via the 1.0 padding column)
    h = jnp.dot(x_ref[...], w1_ref[...], preferred_element_type=jnp.float32)
    h = jnp.maximum(h, 0.0)

    # branch layer 2 + ReLU
    h = jnp.dot(h.astype(dt), wmid_ref[0], preferred_element_type=jnp.float32)
    h = jnp.maximum(h + b[0:1, : h.shape[-1]], 0.0)

    # branch layer 3 (no ReLU) folded with shared layer 1, then ReLU
    h = jnp.dot(h.astype(dt), wmid_ref[1], preferred_element_type=jnp.float32)
    h = jnp.maximum(h + b[1:2, : h.shape[-1]], 0.0)

    # shared layer 2 + ReLU
    h = jnp.dot(h.astype(dt), wmid_ref[2], preferred_element_type=jnp.float32)
    h = jnp.maximum(h + b[2:3, : h.shape[-1]], 0.0)

    # shared layer 3 (no ReLU)
    h = jnp.dot(h.astype(dt), w6_ref[...], preferred_element_type=jnp.float32)
    h = h + b[3:4, : h.shape[-1]]

    out_ref[...] = h.astype(out_ref.dtype)


# --------------------------------------------------------------------------- #
# One-time weight packing (hoisted out of the per-call path).
# --------------------------------------------------------------------------- #
def prepare_params(params, compute_dtype=jnp.bfloat16):
    """Pad / fold / stack / cast the module weights once; returns a dict with
    one packed weight set per branch, ready to feed straight into pallas_call."""
    hi = jax.lax.Precision.HIGHEST
    hidden = params["shared_w1"].shape[0]                # 256
    image_space = params["shared_w2"].shape[1]
    out_pad = _round_up(image_space, _LANE)
    bias_w = max(hidden, out_pad)

    prepared = {"image_space": image_space}
    for branch in ("text", "image"):
        in_feat = params[f"{branch}_w0"].shape[0]
        in_pad = _round_up(in_feat + 1, _LANE)           # +1 row for folded bias

        # W1 padded to (in_pad, hidden); row `in_feat` carries b0 (x gets a 1.0
        # column there), so the kernel needs no first bias-add.
        w1 = jnp.zeros((in_pad, hidden), jnp.float32)
        w1 = w1.at[:in_feat, :].set(params[f"{branch}_w0"])
        w1 = w1.at[in_feat, :].set(params[f"{branch}_b0"])
        w1 = w1.astype(compute_dtype)

        # Fold branch layer 3 (no ReLU) into shared layer 1 (f32, HIGHEST):
        #   W34 = w3 @ w4,  b34 = b3 @ w4 + b4
        w34 = jnp.dot(params[f"{branch}_w2"], params["shared_w0"], precision=hi)
        b34 = jnp.dot(params[f"{branch}_b2"], params["shared_w0"], precision=hi)
        b34 = b34 + params["shared_b0"]

        w_mid = jnp.stack([
            params[f"{branch}_w1"].astype(compute_dtype),
            w34.astype(compute_dtype),
            params["shared_w1"].astype(compute_dtype),
        ])                                               # (3, hidden, hidden)
        w6 = _pad_to(params["shared_w2"], (hidden, out_pad)).astype(compute_dtype)

        biases = jnp.zeros((_SUBLANE, bias_w), jnp.float32)   # biases stay f32
        biases = biases.at[0, :hidden].set(params[f"{branch}_b1"])
        biases = biases.at[1, :hidden].set(b34)
        biases = biases.at[2, :hidden].set(params["shared_b1"])
        biases = biases.at[3, :image_space].set(params["shared_b2"])

        prepared[branch] = {"w1": w1, "w_mid": w_mid, "w6": w6, "biases": biases}
    return prepared


def _choose_tb(batch, batch_tile):
    """Batch tile: multiple of 8, <= batch_tile, and (when batch is large
    enough) at least 2-4 grid steps so v7x's two TensorCores both get work."""
    batch_tile = max(_SUBLANE, _round_up(batch_tile, _SUBLANE))
    batch8 = _round_up(batch, _SUBLANE)
    if batch8 >= 4 * 128:
        steps = 4
    elif batch8 >= 2 * 128:
        steps = 2
    else:
        steps = 1
    tb = _round_up(pl.cdiv(batch8, steps), _SUBLANE)
    return max(_SUBLANE, min(tb, batch_tile))


@functools.partial(jax.jit, static_argnums=(5, 6))
def _forward_impl(x, w1, w_mid, w6, biases, image_space, batch_tile):
    batch, in_feat = x.shape
    in_pad, hidden = w1.shape
    out_pad = w6.shape[1]
    compute_dtype = w1.dtype

    # Feature pad only (no batch pad): a 1.0 column at index `in_feat`
    # activates the folded first-layer bias, then zero-pad to lane-dense width.
    # These pads + the cast fuse into a single XLA op.
    x_p = jnp.pad(x, ((0, 0), (0, 1)), constant_values=1.0)
    if in_pad > in_feat + 1:
        x_p = jnp.pad(x_p, ((0, 0), (0, in_pad - in_feat - 1)))
    x_p = x_p.astype(compute_dtype)

    tb = _choose_tb(batch, batch_tile)
    grid = pl.cdiv(batch, tb)                    # ragged last block is masked

    # Explicit scoped-VMEM budget (v5e default is only 16 MiB); generous f32
    # headroom for intermediates, capped safely under v7x's 64 MiB physical.
    itemsize = jnp.dtype(compute_dtype).itemsize
    vmem_limit = (
        2 * tb * (in_pad + out_pad) * itemsize                              # x/out dbl-buf
        + 2 * (in_pad * hidden + 3 * hidden * hidden + hidden * out_pad) * itemsize
        + 2 * _SUBLANE * biases.shape[1] * 4
        + 8 * tb * hidden * 4                                               # f32 temps
        + (4 << 20)
    )
    vmem_limit = int(min(max(vmem_limit, 16 << 20), 56 << 20))

    out = pl.pallas_call(
        _shared_mlp_kernel,
        out_shape=jax.ShapeDtypeStruct((batch, out_pad), compute_dtype),
        grid_spec=pltpu.PrefetchScalarGridSpec(
            num_scalar_prefetch=0,
            grid=(grid,),
            in_specs=[
                pl.BlockSpec((tb, in_pad), lambda i: (i, 0)),                # x tile
                pl.BlockSpec((in_pad, hidden), lambda i: (0, 0)),            # resident
                pl.BlockSpec((3, hidden, hidden), lambda i: (0, 0, 0)),      # resident
                pl.BlockSpec((hidden, out_pad), lambda i: (0, 0)),           # resident
                pl.BlockSpec((_SUBLANE, biases.shape[1]), lambda i: (0, 0)),  # resident
            ],
            out_specs=pl.BlockSpec((tb, out_pad), lambda i: (i, 0)),
        ),
        compiler_params=pltpu.CompilerParams(
            dimension_semantics=("parallel",),
            vmem_limit_bytes=vmem_limit),
    )(x_p, w1, w_mid, w6, biases)

    return out[:, :image_space]


def shared_layer_forward(x, prepared, input_mode, batch_tile=2048):
    """Fused forward pass of SharedLayerNetwork.

    x:        (batch, text_space) if input_mode == 'text', else (batch, image_space).
    prepared: output of prepare_params(params, compute_dtype).
    Returns (batch, image_space) in the prepared compute dtype (bf16 default).
    """
    if input_mode is None:
        return None
    branch = "text" if input_mode == "text" else "image"
    p = prepared[branch]
    return _forward_impl(x, p["w1"], p["w_mid"], p["w6"], p["biases"],
                         prepared["image_space"], batch_tile)


# --------------------------------------------------------------------------- #
# Parameter init + plain-JAX reference (match the PyTorch module).
# --------------------------------------------------------------------------- #
def _linear_params(key, fan_in, fan_out):
    """Deterministic PyTorch-style uniform init; weight stored as (in, out)."""
    kw, kb = jax.random.split(key)
    bound = 1.0 / jnp.sqrt(fan_in)
    w = jax.random.uniform(kw, (fan_in, fan_out), jnp.float32, -bound, bound)
    b = jax.random.uniform(kb, (fan_out,), jnp.float32, -bound, bound)
    return w, b


def init_params(key, text_space, internal_space, image_space, hidden=256):
    dims = {
        "text": [(text_space, hidden), (hidden, hidden), (hidden, internal_space)],
        "image": [(image_space, hidden), (hidden, hidden), (hidden, internal_space)],
        "shared": [(internal_space, hidden), (hidden, hidden), (hidden, image_space)],
    }
    params = {}
    for name, layer_dims in dims.items():
        for i, (fi, fo) in enumerate(layer_dims):
            key, sub = jax.random.split(key)
            w, b = _linear_params(sub, fi, fo)
            params[f"{name}_w{i}"] = w
            params[f"{name}_b{i}"] = b
    return params


def _reference_forward(x, params, input_mode):
    """Plain-JAX f32 reference matching the PyTorch module."""
    branch = "text" if input_mode == "text" else "image"
    h = x
    for i in range(3):
        h = h @ params[f"{branch}_w{i}"] + params[f"{branch}_b{i}"]
        if i < 2:
            h = jnp.maximum(h, 0.0)
    for i in range(3):
        h = h @ params[f"shared_w{i}"] + params[f"shared_b{i}"]
        if i < 2:
            h = jnp.maximum(h, 0.0)
    return h


if __name__ == "__main__":
    text_space, internal_space, image_space = 32, 64, 48
    batch = 8

    key = jax.random.PRNGKey(0)
    kp, kt, ki = jax.random.split(key, 3)
    params = init_params(kp, text_space, internal_space, image_space)

    x_text = jax.random.normal(kt, (batch, text_space), jnp.float32)
    x_image = jax.random.normal(ki, (batch, image_space), jnp.float32)

    ref_text = _reference_forward(x_text, params, "text")
    ref_image = _reference_forward(x_image, params, "image")

    # --- f32 path: tight check (only diff vs ref is the W34 fold reassociation
    #     and backend matmul rounding) ----------------------------------------
    prep_f32 = prepare_params(params, compute_dtype=jnp.float32)
    out_text_f32 = shared_layer_forward(x_text, prep_f32, "text")
    out_image_f32 = shared_layer_forward(x_image, prep_f32, "image")
    jax.block_until_ready((out_text_f32, out_image_f32))
    assert out_text_f32.shape == (batch, image_space)
    assert out_image_f32.shape == (batch, image_space)
    assert jnp.allclose(out_text_f32, ref_text, atol=1e-3, rtol=1e-3)
    assert jnp.allclose(out_image_f32, ref_image, atol=1e-3, rtol=1e-3)

    # --- default bf16-operand / bf16-output path ------------------------------
    prep_bf16 = prepare_params(params)
    out_text_bf16 = shared_layer_forward(x_text, prep_bf16, "text")
    out_image_bf16 = shared_layer_forward(x_image, prep_bf16, "image")
    jax.block_until_ready((out_text_bf16, out_image_bf16))
    assert out_text_bf16.shape == (batch, image_space)
    assert out_text_bf16.dtype == jnp.bfloat16
    assert jnp.allclose(out_text_bf16.astype(jnp.float32), ref_text,
                        atol=5e-2, rtol=5e-2)
    assert jnp.allclose(out_image_bf16.astype(jnp.float32), ref_image,
                        atol=5e-2, rtol=5e-2)

    print("KERNEL_OK")
</pallas_src>

<mosaic_0001>
module attributes {stable_mosaic.version = 11 : i64} {
  func.func @_shared_mlp_kernel(%arg0: i32, %arg1: memref<8x128xf32, #tpu.memory_space<vmem>>, %arg2: memref<128x256xf32, #tpu.memory_space<vmem>>, %arg3: memref<3x256x256xf32, #tpu.memory_space<vmem>>, %arg4: memref<256x128xf32, #tpu.memory_space<vmem>>, %arg5: memref<8x256xf32, #tpu.memory_space<vmem>>, %arg6: memref<8x128xf32, #tpu.memory_space<vmem>>) attributes {dimension_semantics = [#tpu.dimension_semantics<parallel>], iteration_bounds = array<i64: 1>, scalar_prefetch = 0 : i64, scratch_operands = 0 : i64, tpu.core_type = #tpu.core_type<tc>, window_params = [{transform_indices = @transform_0, window_bounds = array<i64: 8, 128>}, {pipeline_mode = #tpu.pipeline_mode<synchronous>, transform_indices = @transform_1, window_bounds = array<i64: 128, 256>}, {pipeline_mode = #tpu.pipeline_mode<synchronous>, transform_indices = @transform_2, window_bounds = array<i64: 3, 256, 256>}, {pipeline_mode = #tpu.pipeline_mode<synchronous>, transform_indices = @transform_3, window_bounds = array<i64: 256, 128>}, {pipeline_mode = #tpu.pipeline_mode<synchronous>, transform_indices = @transform_4, window_bounds = array<i64: 8, 256>}, {transform_indices = @transform_5, window_bounds = array<i64: 8, 128>}]} {
    %c0 = arith.constant 0 : index
    %c0_0 = arith.constant 0 : index
    %0 = vector.load %arg5[%c0, %c0_0] : memref<8x256xf32, #tpu.memory_space<vmem>>, vector<8x256xf32>
    %c0_1 = arith.constant 0 : index
    %c0_2 = arith.constant 0 : index
    %1 = vector.load %arg1[%c0_1, %c0_2] : memref<8x128xf32, #tpu.memory_space<vmem>>, vector<8x128xf32>
    %c0_3 = arith.constant 0 : index
    %c0_4 = arith.constant 0 : index
    %2 = vector.load %arg2[%c0_3, %c0_4] : memref<128x256xf32, #tpu.memory_space<vmem>>, vector<128x256xf32>
    %cst = arith.constant dense<0.000000e+00> : vector<8x256xf32>
    %3 = tpu.matmul %1, %2, %cst {dimension_numbers = #tpu.dot_dimension_numbers<[1], [0], [0], [1], [0, 0, 1, 1], [], []>} : vector<8x128xf32>, vector<128x256xf32>, vector<8x256xf32> -> vector<8x256xf32>
    %cst_5 = arith.constant 0.000000e+00 : f32
    %4 = vector.broadcast %cst_5 : f32 to vector<8x256xf32>
    %5 = arith.maximumf %3, %4 : vector<8x256xf32>
    %c0_6 = arith.constant 0 : index
    %c0_7 = arith.constant 0 : index
    %c0_8 = arith.constant 0 : index
    %6 = vector.load %arg3[%c0_6, %c0_7, %c0_8] : memref<3x256x256xf32, #tpu.memory_space<vmem>>, vector<1x256x256xf32>
    %7 = vector.shape_cast %6 : vector<1x256x256xf32> to vector<256x256xf32>
    %cst_9 = arith.constant dense<0.000000e+00> : vector<8x256xf32>
    %8 = tpu.matmul %5, %7, %cst_9 {dimension_numbers = #tpu.dot_dimension_numbers<[1], [0], [0], [1], [0, 0, 1, 1], [], []>} : vector<8x256xf32>, vector<256x256xf32>, vector<8x256xf32> -> vector<8x256xf32>
    %9 = vector.extract_strided_slice %0 {offsets = [0, 0], sizes = [1, 256], strides = [1, 1]} : vector<8x256xf32> to vector<1x256xf32>
    %10 = vector.broadcast %9 : vector<1x256xf32> to vector<8x256xf32>
    %11 = arith.addf %8, %10 : vector<8x256xf32>
    %cst_10 = arith.constant 0.000000e+00 : f32
    %12 = vector.broadcast %cst_10 : f32 to vector<8x256xf32>
    %13 = arith.maximumf %11, %12 : vector<8x256xf32>
    %c1 = arith.constant 1 : index
    %c0_11 = arith.constant 0 : index
    %c0_12 = arith.constant 0 : index
    %14 = vector.load %arg3[%c1, %c0_11, %c0_12] : memref<3x256x256xf32, #tpu.memory_space<vmem>>, vector<1x256x256xf32>
    %15 = vector.shape_cast %14 : vector<1x256x256xf32> to vector<256x256xf32>
    %cst_13 = arith.constant dense<0.000000e+00> : vector<8x256xf32>
    %16 = tpu.matmul %13, %15, %cst_13 {dimension_numbers = #tpu.dot_dimension_numbers<[1], [0], [0], [1], [0, 0, 1, 1], [], []>} : vector<8x256xf32>, vector<256x256xf32>, vector<8x256xf32> -> vector<8x256xf32>
    %17 = vector.extract_strided_slice %0 {offsets = [1, 0], sizes = [1, 256], strides = [1, 1]} : vector<8x256xf32> to vector<1x256xf32>
    %18 = vector.broadcast %17 : vector<1x256xf32> to vector<8x256xf32>
    %19 = arith.addf %16, %18 : vector<8x256xf32>
    %cst_14 = arith.constant 0.000000e+00 : f32
    %20 = vector.broadcast %cst_14 : f32 to vector<8x256xf32>
    %21 = arith.maximumf %19, %20 : vector<8x256xf32>
    %c2 = arith.constant 2 : index
    %c0_15 = arith.constant 0 : index
    %c0_16 = arith.constant 0 : index
    %22 = vector.load %arg3[%c2, %c0_15, %c0_16] : memref<3x256x256xf32, #tpu.memory_space<vmem>>, vector<1x256x256xf32>
    %23 = vector.shape_cast %22 : vector<1x256x256xf32> to vector<256x256xf32>
    %cst_17 = arith.constant dense<0.000000e+00> : vector<8x256xf32>
    %24 = tpu.matmul %21, %23, %cst_17 {dimension_numbers = #tpu.dot_dimension_numbers<[1], [0], [0], [1], [0, 0, 1, 1], [], []>} : vector<8x256xf32>, vector<256x256xf32>, vector<8x256xf32> -> vector<8x256xf32>
    %25 = vector.extract_strided_slice %0 {offsets = [2, 0], sizes = [1, 256], strides = [1, 1]} : vector<8x256xf32> to vector<1x256xf32>
    %26 = vector.broadcast %25 : vector<1x256xf32> to vector<8x256xf32>
    %27 = arith.addf %24, %26 : vector<8x256xf32>
    %cst_18 = arith.constant 0.000000e+00 : f32
    %28 = vector.broadcast %cst_18 : f32 to vector<8x256xf32>
    %29 = arith.maximumf %27, %28 : vector<8x256xf32>
    %c0_19 = arith.constant 0 : index
    %c0_20 = arith.constant 0 : index
    %30 = vector.load %arg4[%c0_19, %c0_20] : memref<256x128xf32, #tpu.memory_space<vmem>>, vector<256x128xf32>
    %cst_21 = arith.constant dense<0.000000e+00> : vector<8x128xf32>
    %31 = tpu.matmul %29, %30, %cst_21 {dimension_numbers = #tpu.dot_dimension_numbers<[1], [0], [0], [1], [0, 0, 1, 1], [], []>} : vector<8x256xf32>, vector<256x128xf32>, vector<8x128xf32> -> vector<8x128xf32>
    %32 = vector.extract_strided_slice %0 {offsets = [3, 0], sizes = [1, 128], strides = [1, 1]} : vector<8x256xf32> to vector<1x128xf32>
    %33 = vector.broadcast %32 : vector<1x128xf32> to vector<8x128xf32>
    %34 = arith.addf %31, %33 : vector<8x128xf32>
    %c0_22 = arith.constant 0 : index
    %c0_23 = arith.constant 0 : index
    %35 = vector.load %arg6[%c0_22, %c0_23] : memref<8x128xf32, #tpu.memory_space<vmem>>, vector<8x128xf32>
    tpu.vector_store %arg6[%c0_22, %c0_23], %34 {strides = array<i32>} : memref<8x128xf32, #tpu.memory_space<vmem>>, vector<8x128xf32>,
    return
  }
  func.func @transform_0(%arg0: i32) -> (i32, i32) {
    %c0_i32 = arith.constant 0 : i32
    %c0_i32_0 = arith.constant 0 : i32
    return %arg0, %c0_i32 : i32, i32
  }
  func.func @transform_1(%arg0: i32) -> (i32, i32) {
    %c0_i32 = arith.constant 0 : i32
    %c0_i32_0 = arith.constant 0 : i32
    %c0_i32_1 = arith.constant 0 : i32
    return %c0_i32, %c0_i32_0 : i32, i32
  }
  func.func @transform_2(%arg0: i32) -> (i32, i32, i32) {
    %c0_i32 = arith.constant 0 : i32
    %c0_i32_0 = arith.constant 0 : i32
    %c0_i32_1 = arith.constant 0 : i32
    %c0_i32_2 = arith.constant 0 : i32
    return %c0_i32, %c0_i32_0, %c0_i32_1 : i32, i32, i32
  }
  func.func @transform_3(%arg0: i32) -> (i32, i32) {
    %c0_i32 = arith.constant 0 : i32
    %c0_i32_0 = arith.constant 0 : i32
    %c0_i32_1 = arith.constant 0 : i32
    return %c0_i32, %c0_i32_0 : i32, i32
  }
  func.func @transform_4(%arg0: i32) -> (i32, i32) {
    %c0_i32 = arith.constant 0 : i32
    %c0_i32_0 = arith.constant 0 : i32
    %c0_i32_1 = arith.constant 0 : i32
    return %c0_i32, %c0_i32_0 : i32, i32
  }
  func.func @transform_5(%arg0: i32) -> (i32, i32) {
    %c0_i32 = arith.constant 0 : i32
    %c0_i32_0 = arith.constant 0 : i32
    return %arg0, %c0_i32 : i32, i32
  }
}

</mosaic_0001>

<bundles_post_ra>
// kernel: _forward_impl.1
= control target key start
LH: loop header
LB: loop body
LE: loop exit
PB: predicated region body
PF: predicated region fallthrough
CT: control target
= control target key end

     0   :  { %10 = vsyncpa [#allocation3], 0  ;;  %s937_s0 = inlined_call_operand.vmem [shape: f32[8,128], index: 0, kind: input, shape index: {}]   ;;  %s938_s1 = inlined_call_operand.hbm [shape: f32[128,256], index: 1, kind: input, shape index: {}]   ;;  %s939_s2 = inlined_call_operand.hbm [shape: f32[3,256,256], index: 2, kind: input, shape index: {}]   ;;  %s940_s3 = inlined_call_operand.hbm [shape: f32[256,128], index: 3, kind: input, shape index: {}]   ;;  %s941_s4 = inlined_call_operand.vmem [shape: f32[8,256], index: 4, kind: input, shape index: {}]   ;;  %s942_s5 = inlined_call_operand.hbm [shape: f32[8,128], index: 5, kind: output, shape index: {}]  }
   0x1   :  { %11 = vsyncpa [#allocation6], 0 }
   0x2   :  { %12 = vsyncpa [#allocation4], 0  ;;  %s860_s18 = smov [#allocation5]   ;;  %s861_s20 = smov [#allocation2]  }
   0x3   :  { %s32_s19 = sshll.u32 %s860_s18, 4  ;;  %s20_s21 = sshll.u32 %s861_s20, 4  ;;  %s33_s19 = int_to_ptr.vmem [resolvable:$true] %s32_s19  ;;  %s21_s21 = int_to_ptr.vmem [resolvable:$true] %s20_s21 }
   0x4   :  { %s782_s22 = scalar_lea.vmem %s33_s19, 24576  ;;  %p787_p1 = scmp.lt.s32.totalorder %s33_s19, %s33_s19 }
   0x5   :  { %p783_p0 = scmp.ne.s32.totalorder %s33_s19, %s782_s22  ;;  %p788_p2 = scmp.lt.s32.totalorder %s782_s22, %s782_s22 }
   0x7   :  { %p789_p3 = por %p788_p2, %p787_p1 }
   0x9   :  { %p790_p4 = pnand %p789_p3, %p783_p0 }
   0xb   :  { %793 = shalt.err (!%p790_p4)
}
   0xc   :  { %s862_s23 = smov 256   ;;  %s863_s24 = smov 16  }
   0xd   :  { %38 = dma.hbm_to_vmem [thread:$0]  %s939_s2, 24576, %s33_s19, [#allocation6], %s862_s23, %s862_s23, %s863_s24  }
   0xe   :  { %s802_s27 = scalar_lea.vmem %s21_s21, 4096  ;;  %p807_p6 = scmp.lt.s32.totalorder %s21_s21, %s21_s21 }
   0xf   :  { %p803_p5 = scmp.ne.s32.totalorder %s21_s21, %s802_s27  ;;  %p808_p7 = scmp.lt.s32.totalorder %s802_s27, %s802_s27 }
  0x11   :  { %p809_p8 = por %p808_p7, %p807_p6 }
  0x13   :  { %p810_p9 = pnand %p809_p8, %p803_p5 }
  0x15   :  { %813 = shalt.err (!%p810_p9)
}
  0x16   :  { %26 = dma.hbm_to_vmem [thread:$0]  %s938_s1, 4096, %s21_s21, [#allocation3], %s862_s23, %s862_s23, %s863_s24  }
  0x17   :  { %s864_s30 = smov [#allocation7]  }
  0x18   :  { %s44_s6 = sshll.u32 %s864_s30, 4  ;;  %s45_s6 = int_to_ptr.vmem [resolvable:$true] %s44_s6 }
  0x19   :  { %s822_s7 = scalar_lea.vmem %s45_s6, 4096  ;;  %p827_p11 = scmp.lt.s32.totalorder %s45_s6, %s45_s6 }
  0x1a   :  { %p823_p10 = scmp.ne.s32.totalorder %s45_s6, %s822_s7  ;;  %p828_p12 = scmp.lt.s32.totalorder %s822_s7, %s822_s7 }
  0x1c   :  { %p829_p13 = por %p828_p12, %p827_p11 }
  0x1e   :  { %p830_p0 = pnand %p829_p13, %p823_p10 }
  0x20   :  { %833 = shalt.err (!%p830_p0)
}
  0x21   :  { %s865_s2 = smov 128   ;;  %s866_s8 = smov 8  }
  0x22   :  { %50 = dma.hbm_to_vmem [thread:$0]  %s940_s3, 4096, %s45_s6, [#allocation6], %s865_s2, %s865_s2, %s866_s8  }
  0x23   :  { %854 = dma.done.wait [#allocation3], 4096  }
  0x24   :  { %855 = vsyncadd [#allocation3], 4294963200 }
  0x25   :  { %856 = dma.done.wait [#allocation6], 28672  }
  0x26   :  { %857 = vsyncadd [#allocation6], 4294938624  ;;  %v867_v0 = vmov 0.0   ;;  %v96_v1 = vld [vmem:[#allocation2 + $0xf8] sm:$0xff]  ;;  %v95_v2 = vld [vmem:[#allocation2 + $0xf0] sm:$0xff] }
  0x27   :  { %161 = vmatprep.mubr.f32.mxu0 %v867_v0  ;;  %v94_v3 = vld [vmem:[#allocation2 + $0xe8] sm:$0xff]  ;;  %97 = vmatprep.subr.mxu0 %v96_v1  ;;  %v93_v4 = vld [vmem:[#allocation2 + $0xe0] sm:$0xff]  ;;  %v92_v5 = vld [vmem:[#allocation2 + $0xd8] sm:$0xff] }
  0x28   :  { %98 = vmatpush1.msra.mxu0 %v95_v2  ;;  %v91_v6 = vld [vmem:[#allocation2 + $0xd0] sm:$0xff]  ;;  %v90_v7 = vld [vmem:[#allocation2 + $0xc8] sm:$0xff]  ;;  %v89_v8 = vld [vmem:[#allocation2 + $0xc0] sm:$0xff] }
  0x29   :  { %99 = vmatprep.subr.mxu0 %v94_v3  ;;  %v88_v9 = vld [vmem:[#allocation2 + $0xb8] sm:$0xff]  ;;  %v87_v10 = vld [vmem:[#allocation2 + $0xb0] sm:$0xff]  ;;  %v86_v11 = vld [vmem:[#allocation2 + $0xa8] sm:$0xff] }
  0x2a   :  { %100 = vmatpush1.msra.mxu0 %v93_v4  ;;  %v85_v12 = vld [vmem:[#allocation2 + $0xa0] sm:$0xff]  ;;  %v84_v13 = vld [vmem:[#allocation2 + $0x98] sm:$0xff]  ;;  %v83_v14 = vld [vmem:[#allocation2 + $0x90] sm:$0xff] }
  0x2b   :  { %101 = vmatprep.subr.mxu0 %v92_v5  ;;  %v201_v15 = vld [vmem:[#allocation5 + $0xf8] sm:$0xff]  ;;  %v200_v16 = vld [vmem:[#allocation5 + $0xf0] sm:$0xff]  ;;  %v199_v17 = vld [vmem:[#allocation5 + $0xe8] sm:$0xff] }
  0x2c   :  { %102 = vmatpush1.msra.mxu0 %v91_v6  ;;  %v82_v18 = vld [vmem:[#allocation2 + $0x88] sm:$0xff]  ;;  %242 = vmatprep.subr.mxu1 %v201_v15  ;;  %v198_v19 = vld [vmem:[#allocation5 + $0xe0] sm:$0xff]  ;;  %v197_v21 = vld [vmem:[#allocation5 + $0xd8] sm:$0xff] }
  0x2d   :  { %103 = vmatprep.subr.mxu0 %v90_v7  ;;  %v81_v20 = vld [vmem:[#allocation2 + $0x80] sm:$0xff]  ;;  %243 = vmatpush1.msra.mxu1 %v200_v16  ;;  %v80_v22 = vld [vmem:[#allocation2 + $0x78] sm:$0xff]  ;;  %v196_v23 = vld [vmem:[#allocation5 + $0xd0] sm:$0xff] }
  0x2e   :  { %104 = vmatpush1.msra.mxu0 %v89_v8  ;;  %244 = vmatprep.subr.mxu1 %v199_v17  ;;  %v79_v24 = vld [vmem:[#allocation2 + $0x70] sm:$0xff]  ;;  %v195_v25 = vld [vmem:[#allocation5 + $0xc8] sm:$0xff]  ;;  %v194_v27 = vld [vmem:[#allocation5 + $0xc0] sm:$0xff] }
  0x2f   :  { %105 = vmatprep.subr.mxu0 %v88_v9  ;;  %245 = vmatpush1.msra.mxu1 %v198_v19  ;;  %v78_v26 = vld [vmem:[#allocation2 + $0x68] sm:$0xff]  ;;  %v77_v28 = vld [vmem:[#allocation2 + $0x60] sm:$0xff]  ;;  %v193_v29 = vld [vmem:[#allocation5 + $0xb8] sm:$0xff] }
  0x30   :  { %106 = vmatpush1.msra.mxu0 %v87_v10  ;;  %246 = vmatprep.subr.mxu1 %v197_v21  ;;  %v76_v30 = vld [vmem:[#allocation2 + $0x58] sm:$0xff]  ;;  %v192_v31 = vld [vmem:[#allocation5 + $0xb0] sm:$0xff]  ;;  %v191_v33 = vld [vmem:[#allocation5 + $0xa8] sm:$0xff] }
  0x31   :  { %107 = vmatprep.subr.mxu0 %v86_v11  ;;  %247 = vmatpush1.msra.mxu1 %v196_v23  ;;  %v75_v32 = vld [vmem:[#allocation2 + $0x50] sm:$0xff]  ;;  %v74_v34 = vld [vmem:[#allocation2 + $0x48] sm:$0xff]  ;;  %v190_v35 = vld [vmem:[#allocation5 + $0xa0] sm:$0xff] }
  0x32   :  { %108 = vmatpush1.msra.mxu0 %v85_v12  ;;  %248 = vmatprep.subr.mxu1 %v195_v25  ;;  %v73_v36 = vld [vmem:[#allocation2 + $0x40] sm:$0xff]  ;;  %v189_v37 = vld [vmem:[#allocation5 + $0x98] sm:$0xff]  ;;  %v188_v39 = vld [vmem:[#allocation5 + $0x90] sm:$0xff] }
  0x33   :  { %109 = vmatprep.subr.mxu0 %v84_v13  ;;  %249 = vmatpush1.msra.mxu1 %v194_v27  ;;  %v72_v38 = vld [vmem:[#allocation2 + $0x38] sm:$0xff]  ;;  %v71_v40 = vld [vmem:[#allocation2 + $0x30] sm:$0xff]  ;;  %v187_v41 = vld [vmem:[#allocation5 + $0x88] sm:$0xff] }
  0x34   :  { %110 = vmatpush1.msra.mxu0 %v83_v14  ;;  %250 = vmatprep.subr.mxu1 %v193_v29  ;;  %v70_v42 = vld [vmem:[#allocation2 + $0x28] sm:$0xff]  ;;  %v186_v43 = vld [vmem:[#allocation5 + $0x80] sm:$0xff]  ;;  %v185_v45 = vld [vmem:[#allocation5 + $0x78] sm:$0xff] }
  0x35   :  { %111 = vmatprep.subr.mxu0 %v82_v18  ;;  %251 = vmatpush1.msra.mxu1 %v192_v31  ;;  %v69_v44 = vld [vmem:[#allocation2 + $0x20] sm:$0xff]  ;;  %v68_v46 = vld [vmem:[#allocation2 + $0x18] sm:$0xff]  ;;  %v184_v47 = vld [vmem:[#allocation5 + $0x70] sm:$0xff] }
  0x36   :  { %112 = vmatpush1.msra.mxu0 %v81_v20  ;;  %252 = vmatprep.subr.mxu1 %v191_v33  ;;  %v67_v48 = vld [vmem:[#allocation2 + $0x10] sm:$0xff]  ;;  %v183_v49 = vld [vmem:[#allocation5 + $0x68] sm:$0xff]  ;;  %v182_v51 = vld [vmem:[#allocation5 + $0x60] sm:$0xff] }
  0x37   :  { %113 = vmatprep.subr.mxu0 %v80_v22  ;;  %253 = vmatpush1.msra.mxu1 %v190_v35  ;;  %v66_v50 = vld [vmem:[#allocation2 + $0x8] sm:$0xff]  ;;  %v65_v52 = vld [vmem:[#allocation2] sm:$0xff]  ;;  %v181_v53 = vld [vmem:[#allocation5 + $0x58] sm:$0xff] }
  0x38   :  { %114 = vmatpush1.msra.mxu0 %v79_v24  ;;  %254 = vmatprep.subr.mxu1 %v189_v37  ;;  %v64_v54 = vld [vmem:[%s937_s0] sm:$0xff]  ;;  %v179_v56 = vld [vmem:[#allocation5 + $0x48] sm:$0xff]  ;;  %v178_v57 = vld [vmem:[#allocation5 + $0x40] sm:$0xff] }
  0x39   :  { %115 = vmatprep.subr.mxu0 %v78_v26  ;;  %255 = vmatpush1.msra.mxu1 %v188_v39  ;;  %v180_v55 = vld [vmem:[#allocation5 + $0x50] sm:$0xff]  ;;  %v177_v58 = vld [vmem:[#allocation5 + $0x38] sm:$0xff]  ;;  %v175_v60 = vld [vmem:[#allocation5 + $0x28] sm:$0xff] }
  0x3a   :  { %116 = vmatpush1.msra.mxu0 %v77_v28  ;;  %256 = vmatprep.subr.mxu1 %v187_v41  ;;  %v176_v59 = vld [vmem:[#allocation5 + $0x30] sm:$0xff]  ;;  %v174_v61 = vld [vmem:[#allocation5 + $0x20] sm:$0xff]  ;;  %v173_v62 = vld [vmem:[#allocation5 + $0x18] sm:$0xff] }
  0x3b   :  { %117 = vmatprep.subr.mxu0 %v76_v30  ;;  %257 = vmatpush1.msra.mxu1 %v186_v43  ;;  %v172_v63 = vld [vmem:[#allocation5 + $0x10] sm:$0xff]  ;;  %v171_v0 = vld [vmem:[#allocation5 + $0x8] sm:$0xff]  ;;  %v170_v1 = vld [vmem:[#allocation5] sm:$0xff] }
  0x3c   :  { %118 = vmatpush1.msra.mxu0 %v75_v32  ;;  %258 = vmatprep.subr.mxu1 %v185_v45  ;;  %v233_v2 = vld [vmem:[#allocation5 + $0x1f8] sm:$0xff]  ;;  %v232_v3 = vld [vmem:[#allocation5 + $0x1f0] sm:$0xff]  ;;  %v231_v4 = vld [vmem:[#allocation5 + $0x1e8] sm:$0xff] }
  0x3d   :  { %119 = vmatprep.subr.mxu0 %v74_v34  ;;  %259 = vmatpush1.msra.mxu1 %v184_v47  ;;  %v230_v5 = vld [vmem:[#allocation5 + $0x1e0] sm:$0xff]  ;;  %v229_v6 = vld [vmem:[#allocation5 + $0x1d8] sm:$0xff]  ;;  %v228_v7 = vld [vmem:[#allocation5 + $0x1d0] sm:$0xff] }
  0x3e   :  { %120 = vmatpush1.msra.mxu0 %v73_v36  ;;  %260 = vmatprep.subr.mxu1 %v183_v49  ;;  %v227_v8 = vld [vmem:[#allocation5 + $0x1c8] sm:$0xff]  ;;  %v226_v9 = vld [vmem:[#allocation5 + $0x1c0] sm:$0xff]  ;;  %v225_v10 = vld [vmem:[#allocation5 + $0x1b8] sm:$0xff] }
  0x3f   :  { %121 = vmatprep.subr.mxu0 %v72_v38  ;;  %261 = vmatpush1.msra.mxu1 %v182_v51  ;;  %v224_v11 = vld [vmem:[#allocation5 + $0x1b0] sm:$0xff]  ;;  %v223_v12 = vld [vmem:[#allocation5 + $0x1a8] sm:$0xff]  ;;  %v222_v13 = vld [vmem:[#allocation5 + $0x1a0] sm:$0xff] }
  0x40   :  { %122 = vmatpush1.msra.mxu0 %v71_v40  ;;  %262 = vmatprep.subr.mxu1 %v181_v53  ;;  %v221_v14 = vld [vmem:[#allocation5 + $0x198] sm:$0xff]  ;;  %v220_v15 = vld [vmem:[#allocation5 + $0x190] sm:$0xff]  ;;  %v219_v16 = vld [vmem:[#allocation5 + $0x188] sm:$0xff] }
  0x41   :  { %123 = vmatprep.subr.mxu0 %v70_v42  ;;  %263 = vmatpush1.msra.mxu1 %v180_v55  ;;  %v218_v17 = vld [vmem:[#allocation5 + $0x180] sm:$0xff]  ;;  %v217_v18 = vld [vmem:[#allocation5 + $0x178] sm:$0xff]  ;;  %v216_v19 = vld [vmem:[#allocation5 + $0x170] sm:$0xff] }
  0x42   :  { %124 = vmatpush1.msra.mxu0 %v69_v44  ;;  %264 = vmatprep.subr.mxu1 %v179_v56  ;;  %v215_v20 = vld [vmem:[#allocation5 + $0x168] sm:$0xff]  ;;  %v214_v21 = vld [vmem:[#allocation5 + $0x160] sm:$0xff]  ;;  %v213_v22 = vld [vmem:[#allocation5 + $0x158] sm:$0xff] }
  0x43   :  { %125 = vmatprep.subr.mxu0 %v68_v46  ;;  %265 = vmatpush1.msra.mxu1 %v178_v57  ;;  %v212_v23 = vld [vmem:[#allocation5 + $0x150] sm:$0xff]  ;;  %v211_v24 = vld [vmem:[#allocation5 + $0x148] sm:$0xff]  ;;  %v210_v25 = vld [vmem:[#allocation5 + $0x140] sm:$0xff] }
  0x44   :  { %126 = vmatpush1.msra.mxu0 %v67_v48  ;;  %266 = vmatprep.subr.mxu1 %v177_v58  ;;  %v209_v26 = vld [vmem:[#allocation5 + $0x138] sm:$0xff]  ;;  %v208_v27 = vld [vmem:[#allocation5 + $0x130] sm:$0xff]  ;;  %v207_v28 = vld [vmem:[#allocation5 + $0x128] sm:$0xff] }
  0x45   :  { %127 = vmatprep.subr.mxu0 %v66_v50  ;;  %267 = vmatpush1.msra.mxu1 %v176_v59  ;;  %v206_v29 = vld [vmem:[#allocation5 + $0x120] sm:$0xff]  ;;  %v205_v30 = vld [vmem:[#allocation5 + $0x118] sm:$0xff]  ;;  %v204_v31 = vld [vmem:[#allocation5 + $0x110] sm:$0xff] }
  0x46   :  { %128 = vmatpush1.msra.mxu0 %v65_v52  ;;  %268 = vmatprep.subr.mxu1 %v175_v60  ;;  %v203_v32 = vld [vmem:[#allocation5 + $0x108] sm:$0xff]  ;;  %v202_v33 = vld [vmem:[#allocation5 + $0x100] sm:$0xff]  ;;  %v347_v34 = vld [vmem:[#allocation5 + $0x2f8] sm:$0xff] }
  0x47   :  { %162 = vmatmul.mubr.f32.vlgmr.msra.gmra.mxu0 %v64_v54  ;;  %269 = vmatpush1.msra.mxu1 %v174_v61  ;;  %v346_v35 = vld [vmem:[#allocation5 + $0x2f0] sm:$0xff]  ;;  %v345_v36 = vld [vmem:[#allocation5 + $0x2e8] sm:$0xff]  ;;  %v344_v37 = vld [vmem:[#allocation5 + $0x2e0] sm:$0xff] }
  0x48   :  { %270 = vmatprep.subr.mxu1 %v173_v62  ;;  %388 = vmatprep.subr.mxu0 %v347_v34  ;;  %v343_v38 = vld [vmem:[#allocation5 + $0x2d8] sm:$0xff]  ;;  %v342_v39 = vld [vmem:[#allocation5 + $0x2d0] sm:$0xff]  ;;  %v341_v40 = vld [vmem:[#allocation5 + $0x2c8] sm:$0xff] }
  0x49   :  { %271 = vmatpush1.msra.mxu1 %v172_v63  ;;  %389 = vmatpush1.msra.mxu0 %v346_v35  ;;  %v340_v41 = vld [vmem:[#allocation5 + $0x2c0] sm:$0xff]  ;;  %v339_v42 = vld [vmem:[#allocation5 + $0x2b8] sm:$0xff]  ;;  %v338_v43 = vld [vmem:[#allocation5 + $0x2b0] sm:$0xff] }
  0x4a   :  { %272 = vmatprep.subr.mxu1 %v171_v0  ;;  %390 = vmatprep.subr.mxu0 %v345_v36  ;;  %v337_v44 = vld [vmem:[#allocation5 + $0x2a8] sm:$0xff]  ;;  %v336_v45 = vld [vmem:[#allocation5 + $0x2a0] sm:$0xff]  ;;  %v335_v46 = vld [vmem:[#allocation5 + $0x298] sm:$0xff] }
  0x4b   :  { %273 = vmatpush1.msra.mxu1 %v170_v1  ;;  %391 = vmatpush1.msra.mxu0 %v344_v37  ;;  %v334_v47 = vld [vmem:[#allocation5 + $0x290] sm:$0xff]  ;;  %v333_v48 = vld [vmem:[#allocation5 + $0x288] sm:$0xff]  ;;  %v332_v49 = vld [vmem:[#allocation5 + $0x280] sm:$0xff] }
  0x4c   :  { %274 = vmatprep.subr.mxu1 %v233_v2  ;;  %392 = vmatprep.subr.mxu0 %v343_v38  ;;  %v331_v50 = vld [vmem:[#allocation5 + $0x278] sm:$0xff]  ;;  %v330_v51 = vld [vmem:[#allocation5 + $0x270] sm:$0xff]  ;;  %v329_v52 = vld [vmem:[#allocation5 + $0x268] sm:$0xff] }
  0x4d   :  { %275 = vmatpush2.msra.mxu1 %v232_v3  ;;  %393 = vmatpush1.msra.mxu0 %v342_v39  ;;  %v328_v53 = vld [vmem:[#allocation5 + $0x260] sm:$0xff]  ;;  %v327_v54 = vld [vmem:[#allocation5 + $0x258] sm:$0xff]  ;;  %v326_v55 = vld [vmem:[#allocation5 + $0x250] sm:$0xff] }
  0x4e   :  { %276 = vmatprep.subr.mxu1 %v231_v4  ;;  %394 = vmatprep.subr.mxu0 %v341_v40  ;;  %v325_v56 = vld [vmem:[#allocation5 + $0x248] sm:$0xff]  ;;  %v324_v57 = vld [vmem:[#allocation5 + $0x240] sm:$0xff]  ;;  %v323_v58 = vld [vmem:[#allocation5 + $0x238] sm:$0xff] }
  0x4f   :  { %277 = vmatpush2.msra.mxu1 %v230_v5  ;;  %395 = vmatpush1.msra.mxu0 %v340_v41  ;;  %v322_v59 = vld [vmem:[#allocation5 + $0x230] sm:$0xff]  ;;  %v321_v60 = vld [vmem:[#allocation5 + $0x228] sm:$0xff]  ;;  %v320_v61 = vld [vmem:[#allocation5 + $0x220] sm:$0xff] }
  0x50   :  { %278 = vmatprep.subr.mxu1 %v229_v6  ;;  %396 = vmatprep.subr.mxu0 %v339_v42  ;;  %v319_v62 = vld [vmem:[#allocation5 + $0x218] sm:$0xff]  ;;  %v318_v63 = vld [vmem:[#allocation5 + $0x210] sm:$0xff]  ;;  %v317_v0 = vld [vmem:[#allocation5 + $0x208] sm:$0xff] }
  0x51   :  { %279 = vmatpush2.msra.mxu1 %v228_v7  ;;  %397 = vmatpush1.msra.mxu0 %v338_v43  ;;  %v316_v1 = vld [vmem:[#allocation5 + $0x200] sm:$0xff]  ;;  %v379_v2 = vld [vmem:[#allocation5 + $0x3f8] sm:$0xff]  ;;  %v378_v3 = vld [vmem:[#allocation5 + $0x3f0] sm:$0xff] }
  0x52   :  { %280 = vmatprep.subr.mxu1 %v227_v8  ;;  %398 = vmatprep.subr.mxu0 %v337_v44  ;;  %v377_v4 = vld [vmem:[#allocation5 + $0x3e8] sm:$0xff]  ;;  %v376_v5 = vld [vmem:[#allocation5 + $0x3e0] sm:$0xff]  ;;  %v375_v6 = vld [vmem:[#allocation5 + $0x3d8] sm:$0xff] }
  0x53   :  { %281 = vmatpush2.msra.mxu1 %v226_v9  ;;  %399 = vmatpush1.msra.mxu0 %v336_v45  ;;  %v374_v7 = vld [vmem:[#allocation5 + $0x3d0] sm:$0xff]  ;;  %v373_v8 = vld [vmem:[#allocation5 + $0x3c8] sm:$0xff]  ;;  %v372_v9 = vld [vmem:[#allocation5 + $0x3c0] sm:$0xff] }
  0x54   :  { %282 = vmatprep.subr.mxu1 %v225_v10  ;;  %400 = vmatprep.subr.mxu0 %v335_v46  ;;  %v371_v10 = vld [vmem:[#allocation5 + $0x3b8] sm:$0xff]  ;;  %v350_v35 = vld [vmem:[#allocation5 + $0x310] sm:$0xff]  ;;  %v349_v36 = vld [vmem:[#allocation5 + $0x308] sm:$0xff] }
  0x55   :  { %283 = vmatpush2.msra.mxu1 %v224_v11  ;;  %401 = vmatpush1.msra.mxu0 %v334_v47  ;;  %v370_v11 = vld [vmem:[#allocation5 + $0x3b0] sm:$0xff]  ;;  %v351_v34 = vld [vmem:[#allocation5 + $0x318] sm:$0xff]  ;;  %v348_v37 = vld [vmem:[#allocation5 + $0x300] sm:$0xff] }
  0x56   :  { %284 = vmatprep.subr.mxu1 %v223_v12  ;;  %402 = vmatprep.subr.mxu0 %v333_v48  ;;  %v369_v12 = vld [vmem:[#allocation5 + $0x3a8] sm:$0xff]  ;;  %v493_v38 = vld [vmem:[#allocation5 + $0x4f8] sm:$0xff]  ;;  %v492_v39 = vld [vmem:[#allocation5 + $0x4f0] sm:$0xff] }
  0x57   :  { %285 = vmatpush2.msra.mxu1 %v222_v13  ;;  %403 = vmatpush1.msra.mxu0 %v332_v49  ;;  %v368_v13 = vld [vmem:[#allocation5 + $0x3a0] sm:$0xff]  ;;  %v491_v40 = vld [vmem:[#allocation5 + $0x4e8] sm:$0xff]  ;;  %v489_v42 = vld [vmem:[#allocation5 + $0x4d8] sm:$0xff] }
  0x58   :  { %286 = vmatprep.subr.mxu1 %v221_v14  ;;  %404 = vmatprep.subr.mxu0 %v331_v50  ;;  %v367_v14 = vld [vmem:[#allocation5 + $0x398] sm:$0xff]  ;;  %v490_v41 = vld [vmem:[#allocation5 + $0x4e0] sm:$0xff]  ;;  %v488_v43 = vld [vmem:[#allocation5 + $0x4d0] sm:$0xff] }
  0x59   :  { %287 = vmatpush2.msra.mxu1 %v220_v15  ;;  %405 = vmatpush1.msra.mxu0 %v330_v51  ;;  %v366_v15 = vld [vmem:[#allocation5 + $0x390] sm:$0xff]  ;;  %v487_v44 = vld [vmem:[#allocation5 + $0x4c8] sm:$0xff]  ;;  %v486_v45 = vld [vmem:[#allocation5 + $0x4c0] sm:$0xff] }
  0x5a   :  { %288 = vmatprep.subr.mxu1 %v219_v16  ;;  %406 = vmatprep.subr.mxu0 %v329_v52  ;;  %v365_v16 = vld [vmem:[#allocation5 + $0x388] sm:$0xff]  ;;  %v485_v46 = vld [vmem:[#allocation5 + $0x4b8] sm:$0xff]  ;;  %v484_v47 = vld [vmem:[#allocation5 + $0x4b0] sm:$0xff] }
  0x5b   :  { %289 = vmatpush2.msra.mxu1 %v218_v17  ;;  %407 = vmatpush1.msra.mxu0 %v328_v53  ;;  %v364_v17 = vld [vmem:[#allocation5 + $0x380] sm:$0xff]  ;;  %v483_v48 = vld [vmem:[#allocation5 + $0x4a8] sm:$0xff]  ;;  %v481_v50 = vld [vmem:[#allocation5 + $0x498] sm:$0xff] }
  0x5c   :  { %290 = vmatprep.subr.mxu1 %v217_v18  ;;  %408 = vmatprep.subr.mxu0 %v327_v54  ;;  %v363_v18 = vld [vmem:[#allocation5 + $0x378] sm:$0xff]  ;;  %v482_v49 = vld [vmem:[#allocation5 + $0x4a0] sm:$0xff]  ;;  %v480_v51 = vld [vmem:[#allocation5 + $0x490] sm:$0xff] }
  0x5d   :  { %291 = vmatpush2.msra.mxu1 %v216_v19  ;;  %409 = vmatpush1.msra.mxu0 %v326_v55  ;;  %v362_v19 = vld [vmem:[#allocation5 + $0x370] sm:$0xff]  ;;  %v479_v52 = vld [vmem:[#allocation5 + $0x488] sm:$0xff]  ;;  %v478_v53 = vld [vmem:[#allocation5 + $0x480] sm:$0xff] }
  0x5e   :  { %292 = vmatprep.subr.mxu1 %v215_v20  ;;  %410 = vmatprep.subr.mxu0 %v325_v56  ;;  %v361_v20 = vld [vmem:[#allocation5 + $0x368] sm:$0xff]  ;;  %v477_v54 = vld [vmem:[#allocation5 + $0x478] sm:$0xff]  ;;  %v476_v55 = vld [vmem:[#allocation5 + $0x470] sm:$0xff] }
  0x5f   :  { %293 = vmatpush2.msra.mxu1 %v214_v21  ;;  %411 = vmatpush1.msra.mxu0 %v324_v57  ;;  %v360_v21 = vld [vmem:[#allocation5 + $0x360] sm:$0xff]  ;;  %v475_v56 = vld [vmem:[#allocation5 + $0x468] sm:$0xff] }
  0x60   :  { %294 = vmatprep.subr.mxu1 %v213_v22  ;;  %412 = vmatprep.subr.mxu0 %v323_v58  ;;  %v359_v22 = vld [vmem:[#allocation5 + $0x358] sm:$0xff]  ;;  %v474_v57 = vld [vmem:[#allocation5 + $0x460] sm:$0xff] }
  0x61   :  { %295 = vmatpush2.msra.mxu1 %v212_v23  ;;  %413 = vmatpush1.msra.mxu0 %v322_v59  ;;  %v358_v23 = vld [vmem:[#allocation5 + $0x350] sm:$0xff]  ;;  %v473_v58 = vld [vmem:[#allocation5 + $0x458] sm:$0xff] }
  0x62   :  { %296 = vmatprep.subr.mxu1 %v211_v24  ;;  %414 = vmatprep.subr.mxu0 %v321_v60  ;;  %v357_v24 = vld [vmem:[#allocation5 + $0x348] sm:$0xff]  ;;  %v472_v59 = vld [vmem:[#allocation5 + $0x450] sm:$0xff] }
  0x63   :  { %297 = vmatpush2.msra.mxu1 %v210_v25  ;;  %415 = vmatpush1.msra.mxu0 %v320_v61  ;;  %v356_v25 = vld [vmem:[#allocation5 + $0x340] sm:$0xff]  ;;  %v471_v60 = vld [vmem:[#allocation5 + $0x448] sm:$0xff] }
  0x64   :  { %298 = vmatprep.subr.mxu1 %v209_v26  ;;  %416 = vmatprep.subr.mxu0 %v319_v62  ;;  %v470_v61 = vld [vmem:[#allocation5 + $0x440] sm:$0xff]  ;;  %v469_v62 = vld [vmem:[#allocation5 + $0x438] sm:$0xff] }
  0x65   :  { %299 = vmatpush2.msra.mxu1 %v208_v27  ;;  %417 = vmatpush1.msra.mxu0 %v318_v63  ;;  %v468_v63 = vld [vmem:[#allocation5 + $0x430] sm:$0xff] }
  0x66   :  { %300 = vmatprep.subr.mxu1 %v207_v28  ;;  %418 = vmatprep.subr.mxu0 %v317_v0  ;;  %v467_v0 = vld [vmem:[#allocation5 + $0x428] sm:$0xff] }
  0x67   :  { %301 = vmatpush2.msra.mxu1 %v206_v29  ;;  %419 = vmatpush1.msra.mxu0 %v316_v1  ;;  %v466_v1 = vld [vmem:[#allocation5 + $0x420] sm:$0xff] }
  0x68   :  { %302 = vmatprep.subr.mxu1 %v205_v30  ;;  %420 = vmatprep.subr.mxu0 %v379_v2  ;;  %v355_v30 = vld [vmem:[#allocation5 + $0x338] sm:$0xff] }
  0x69   :  { %303 = vmatpush2.msra.mxu1 %v204_v31  ;;  %421 = vmatpush2.msra.mxu0 %v378_v3  ;;  %v354_v31 = vld [vmem:[#allocation5 + $0x330] sm:$0xff]  ;;  %v465_v2 = vld [vmem:[#allocation5 + $0x418] sm:$0xff] }
  0x6a   :  { %304 = vmatprep.subr.mxu1 %v203_v32  ;;  %422 = vmatprep.subr.mxu0 %v377_v4  ;;  %v353_v32 = vld [vmem:[#allocation5 + $0x328] sm:$0xff]  ;;  %v464_v3 = vld [vmem:[#allocation5 + $0x410] sm:$0xff] }
  0x6b   :  { %305 = vmatpush2.msra.mxu1 %v202_v33  ;;  %423 = vmatpush2.msra.mxu0 %v376_v5  ;;  %v352_v33 = vld [vmem:[#allocation5 + $0x320] sm:$0xff]  ;;  %v463_v4 = vld [vmem:[#allocation5 + $0x408] sm:$0xff] }
  0x6c   :  { %424 = vmatprep.subr.mxu0 %v375_v6  ;;  %534 = vmatprep.subr.mxu1 %v493_v38  ;;  %v462_v5 = vld [vmem:[#allocation5 + $0x400] sm:$0xff]  ;;  %v525_v6 = vld [vmem:[#allocation5 + $0x5f8] sm:$0xff] }
  0x6d   :  { %425 = vmatpush2.msra.mxu0 %v374_v7  ;;  %v524_v7 = vld [vmem:[#allocation5 + $0x5f0] sm:$0xff] }
  0x6e   :  { %426 = vmatprep.subr.mxu0 %v373_v8  ;;  %v523_v8 = vld [vmem:[#allocation5 + $0x5e8] sm:$0xff] }
  0x6f   :  { %427 = vmatpush2.msra.mxu0 %v372_v9  ;;  %v522_v9 = vld [vmem:[#allocation5 + $0x5e0] sm:$0xff] }
  0x70   :  { %428 = vmatprep.subr.mxu0 %v371_v10  ;;  %v521_v10 = vld [vmem:[#allocation5 + $0x5d8] sm:$0xff] }
  0x71   :  { %429 = vmatpush2.msra.mxu0 %v370_v11  ;;  %v520_v11 = vld [vmem:[#allocation5 + $0x5d0] sm:$0xff] }
  0x72   :  { %430 = vmatprep.subr.mxu0 %v369_v12  ;;  %v519_v12 = vld [vmem:[#allocation5 + $0x5c8] sm:$0xff] }
  0x73   :  { %431 = vmatpush2.msra.mxu0 %v368_v13  ;;  %v518_v13 = vld [vmem:[#allocation5 + $0x5c0] sm:$0xff] }
  0x74   :  { %432 = vmatprep.subr.mxu0 %v367_v14  ;;  %v517_v14 = vld [vmem:[#allocation5 + $0x5b8] sm:$0xff] }
  0x75   :  { %433 = vmatpush2.msra.mxu0 %v366_v15  ;;  %v516_v15 = vld [vmem:[#allocation5 + $0x5b0] sm:$0xff] }
  0x76   :  { %434 = vmatprep.subr.mxu0 %v365_v16  ;;  %v515_v16 = vld [vmem:[#allocation5 + $0x5a8] sm:$0xff] }
  0x77   :  { %435 = vmatpush2.msra.mxu0 %v364_v17  ;;  %v514_v17 = vld [vmem:[#allocation5 + $0x5a0] sm:$0xff] }
  0x78   :  { %436 = vmatprep.subr.mxu0 %v363_v18  ;;  %v513_v18 = vld [vmem:[#allocation5 + $0x598] sm:$0xff] }
  0x79   :  { %437 = vmatpush2.msra.mxu0 %v362_v19  ;;  %v512_v19 = vld [vmem:[#allocation5 + $0x590] sm:$0xff] }
  0x7a   :  { %438 = vmatprep.subr.mxu0 %v361_v20  ;;  %v511_v20 = vld [vmem:[#allocation5 + $0x588] sm:$0xff] }
  0x7b   :  { %439 = vmatpush2.msra.mxu0 %v360_v21  ;;  %v510_v21 = vld [vmem:[#allocation5 + $0x580] sm:$0xff] }
  0x7c   :  { %440 = vmatprep.subr.mxu0 %v359_v22  ;;  %v509_v22 = vld [vmem:[#allocation5 + $0x578] sm:$0xff] }
  0x7d   :  { %441 = vmatpush2.msra.mxu0 %v358_v23  ;;  %v508_v23 = vld [vmem:[#allocation5 + $0x570] sm:$0xff] }
  0x7e   :  { %442 = vmatprep.subr.mxu0 %v357_v24  ;;  %v507_v24 = vld [vmem:[#allocation5 + $0x568] sm:$0xff] }
  0x7f   :  { %443 = vmatpush2.msra.mxu0 %v356_v25  ;;  %v506_v25 = vld [vmem:[#allocation5 + $0x560] sm:$0xff] }
  0x80   :  { %444 = vmatprep.subr.mxu0 %v355_v30  ;;  %v234_v30 = vlaneseq }
  0x81   :  { %445 = vmatpush2.msra.mxu0 %v354_v31 }
  0x82   :  { %446 = vmatprep.subr.mxu0 %v353_v32  ;;  %v911_v31 = vshrl.u32 %v234_v30, 7 }
  0x83   :  { %447 = vmatpush2.msra.mxu0 %v352_v33  ;;  %v917_v33 = vld [vmem:[%s941_s4] sm:$0xff] }
  0x84   :  { %448 = vmatprep.subr.mxu0 %v351_v34  ;;  %v236_v32 = vsub.s32 0, %v911_v31  ;;  %v922_v34 = vld [vmem:[%s941_s4 + $0x8] sm:$0xff]  ;;  %s868_s4 = smov [#allocation8]  }
  0x85   :  { %449 = vmatpush2.msra.mxu0 %v350_v35  ;;  %s720_s14 = sshll.u32 %s868_s4, 4  ;;  %s721_s14 = int_to_ptr.vmem [resolvable:$true] %s720_s14 }
  0x86   :  { %450 = vmatprep.subr.mxu0 %v349_v36  ;;  %v237_v35 = vrot.slane %v917_v33, %v236_v32  ;;  %v241_v36 = vrot.slane %v922_v34, %v236_v32  ;;  %s834_s15 = scalar_lea.vmem %s721_s14, 128  ;;  %p839_p2 = scmp.lt.s32.totalorder %s721_s14, %s721_s14 }
  0x87   :  { %451 = vmatpush2.msra.mxu0 %v348_v37  ;;  %p835_p1 = scmp.ne.s32.totalorder %s721_s14, %s834_s15  ;;  %p840_p3 = scmp.lt.s32.totalorder %s834_s15, %s834_s15 }
  0x89   :  { %p841_p4 = por %p840_p3, %p839_p2 }
  0x8b   :  { %p842_p5 = pnand %p841_p4, %p835_p1 }
 0x107   :  { %v163_v26 = vpop.f32.mrf.mxu0 }
 0x108   :  { %v168_v29 = vmax.f32 %v163_v26, 0.0  ;;  %v505_v26 = vld [vmem:[#allocation5 + $0x558] sm:$0xff] }
 0x109   :  { %v165_v27 = vpop.f32.mrf.mxu0 }
 0x10a   :  { %v169_v28 = vmax.f32 %v165_v27, 0.0  ;;  %v504_v27 = vld [vmem:[#allocation5 + $0x550] sm:$0xff] }
 0x10c   :  { %306 = vmatprep.mubr.f32.mxu1 %v169_v28  ;;  %v503_v28 = vld [vmem:[#allocation5 + $0x548] sm:$0xff] }
 0x10d   :  { %307 = vmatmul.mubr.f32.vlgmr.msra.gmra.mxu1 %v168_v29  ;;  %v502_v29 = vld [vmem:[#allocation5 + $0x540] sm:$0xff] }
 0x10e   :  { %535 = vmatpush1.msra.mxu1 %v492_v39 }
 0x10f   :  { %536 = vmatprep.subr.mxu1 %v491_v40 }
 0x110   :  { %537 = vmatpush1.msra.mxu1 %v490_v41 }
 0x111   :  { %538 = vmatprep.subr.mxu1 %v489_v42 }
 0x112   :  { %539 = vmatpush1.msra.mxu1 %v488_v43  ;;  %v501_v43 = vld [vmem:[#allocation5 + $0x538] sm:$0xff] }
 0x113   :  { %540 = vmatprep.subr.mxu1 %v487_v44  ;;  %v500_v44 = vld [vmem:[#allocation5 + $0x530] sm:$0xff] }
 0x114   :  { %541 = vmatpush1.msra.mxu1 %v486_v45  ;;  %v499_v45 = vld [vmem:[#allocation5 + $0x528] sm:$0xff] }
 0x115   :  { %542 = vmatprep.subr.mxu1 %v485_v46  ;;  %v498_v46 = vld [vmem:[#allocation5 + $0x520] sm:$0xff] }
 0x116   :  { %543 = vmatpush1.msra.mxu1 %v484_v47  ;;  %v497_v47 = vld [vmem:[#allocation5 + $0x518] sm:$0xff] }
 0x117   :  { %544 = vmatprep.subr.mxu1 %v483_v48  ;;  %v496_v48 = vld [vmem:[#allocation5 + $0x510] sm:$0xff] }
 0x118   :  { %545 = vmatpush1.msra.mxu1 %v482_v49  ;;  %v495_v49 = vld [vmem:[#allocation5 + $0x508] sm:$0xff] }
 0x119   :  { %546 = vmatprep.subr.mxu1 %v481_v50  ;;  %v494_v50 = vld [vmem:[#allocation5 + $0x500] sm:$0xff] }
 0x11a   :  { %547 = vmatpush1.msra.mxu1 %v480_v51  ;;  %v638_v51 = vld [vmem:[#allocation7 + $0xf8] sm:$0xff] }
 0x11b   :  { %548 = vmatprep.subr.mxu1 %v479_v52  ;;  %v622_v52 = vld [vmem:[#allocation7 + $0x78] sm:$0xff]  ;;  %730 = vmatprep.subr.mxu0 %v638_v51 }
 0x11c   :  { %549 = vmatpush1.msra.mxu1 %v478_v53  ;;  %v637_v53 = vld [vmem:[#allocation7 + $0xf0] sm:$0xff] }
 0x11d   :  { %550 = vmatprep.subr.mxu1 %v477_v54  ;;  %v621_v54 = vld [vmem:[#allocation7 + $0x70] sm:$0xff] }
 0x11e   :  { %551 = vmatpush1.msra.mxu1 %v476_v55  ;;  %v636_v55 = vld [vmem:[#allocation7 + $0xe8] sm:$0xff] }
 0x11f   :  { %552 = vmatprep.subr.mxu1 %v475_v56  ;;  %v620_v56 = vld [vmem:[#allocation7 + $0x68] sm:$0xff] }
 0x120   :  { %553 = vmatpush1.msra.mxu1 %v474_v57  ;;  %v635_v57 = vld [vmem:[#allocation7 + $0xe0] sm:$0xff] }
 0x121   :  { %554 = vmatprep.subr.mxu1 %v473_v58  ;;  %v619_v58 = vld [vmem:[#allocation7 + $0x60] sm:$0xff] }
 0x122   :  { %555 = vmatpush1.msra.mxu1 %v472_v59  ;;  %v634_v59 = vld [vmem:[#allocation7 + $0xd8] sm:$0xff] }
 0x123   :  { %556 = vmatprep.subr.mxu1 %v471_v60  ;;  %v618_v60 = vld [vmem:[#allocation7 + $0x58] sm:$0xff] }
 0x124   :  { %557 = vmatpush1.msra.mxu1 %v470_v61  ;;  %v633_v61 = vld [vmem:[#allocation7 + $0xd0] sm:$0xff] }
 0x125   :  { %558 = vmatprep.subr.mxu1 %v469_v62  ;;  %v617_v62 = vld [vmem:[#allocation7 + $0x50] sm:$0xff] }
 0x126   :  { %559 = vmatpush1.msra.mxu1 %v468_v63  ;;  %v632_v63 = vld [vmem:[#allocation7 + $0xc8] sm:$0xff] }
 0x127   :  { %560 = vmatprep.subr.mxu1 %v467_v0  ;;  %v616_v0 = vld [vmem:[#allocation7 + $0x48] sm:$0xff] }
 0x128   :  { %561 = vmatpush1.msra.mxu1 %v466_v1  ;;  %v631_v1 = vld [vmem:[#allocation7 + $0xc0] sm:$0xff] }
 0x129   :  { %562 = vmatprep.subr.mxu1 %v465_v2  ;;  %v615_v2 = vld [vmem:[#allocation7 + $0x40] sm:$0xff] }
 0x12a   :  { %563 = vmatpush1.msra.mxu1 %v464_v3  ;;  %v630_v3 = vld [vmem:[#allocation7 + $0xb8] sm:$0xff] }
 0x12b   :  { %564 = vmatprep.subr.mxu1 %v463_v4  ;;  %v614_v4 = vld [vmem:[#allocation7 + $0x38] sm:$0xff] }
 0x12c   :  { %565 = vmatpush1.msra.mxu1 %v462_v5  ;;  %v629_v5 = vld [vmem:[#allocation7 + $0xb0] sm:$0xff] }
 0x12d   :  { %566 = vmatprep.subr.mxu1 %v525_v6  ;;  %v613_v6 = vld [vmem:[#allocation7 + $0x30] sm:$0xff] }
 0x12e   :  { %567 = vmatpush2.msra.mxu1 %v524_v7  ;;  %v628_v7 = vld [vmem:[#allocation7 + $0xa8] sm:$0xff] }
 0x12f   :  { %568 = vmatprep.subr.mxu1 %v523_v8  ;;  %v612_v8 = vld [vmem:[#allocation7 + $0x28] sm:$0xff] }
 0x130   :  { %569 = vmatpush2.msra.mxu1 %v522_v9  ;;  %v627_v9 = vld [vmem:[#allocation7 + $0xa0] sm:$0xff] }
 0x131   :  { %570 = vmatprep.subr.mxu1 %v521_v10  ;;  %v611_v10 = vld [vmem:[#allocation7 + $0x20] sm:$0xff] }
 0x132   :  { %571 = vmatpush2.msra.mxu1 %v520_v11  ;;  %v382_v11 = vsub.s32 1, %v911_v31 }
 0x133   :  { %572 = vmatprep.subr.mxu1 %v519_v12 }
 0x134   :  { %573 = vmatpush2.msra.mxu1 %v518_v13  ;;  %v383_v12 = vrot.slane %v917_v33, %v382_v11  ;;  %v387_v13 = vrot.slane %v922_v34, %v382_v11 }
 0x135   :  { %574 = vmatprep.subr.mxu1 %v517_v14 }
 0x136   :  { %575 = vmatpush2.msra.mxu1 %v516_v15 }
 0x137   :  { %576 = vmatprep.subr.mxu1 %v515_v16 }
 0x138   :  { %577 = vmatpush2.msra.mxu1 %v514_v17 }
 0x139   :  { %578 = vmatprep.subr.mxu1 %v513_v18 }
 0x13a   :  { %579 = vmatpush2.msra.mxu1 %v512_v19 }
 0x13b   :  { %580 = vmatprep.subr.mxu1 %v511_v20  ;;  %v626_v20 = vld [vmem:[#allocation7 + $0x98] sm:$0xff] }
 0x13c   :  { %581 = vmatpush2.msra.mxu1 %v510_v21  ;;  %v610_v21 = vld [vmem:[#allocation7 + $0x18] sm:$0xff] }
 0x13d   :  { %582 = vmatprep.subr.mxu1 %v509_v22  ;;  %v625_v22 = vld [vmem:[#allocation7 + $0x90] sm:$0xff] }
 0x13e   :  { %583 = vmatpush2.msra.mxu1 %v508_v23  ;;  %v609_v23 = vld [vmem:[#allocation7 + $0x10] sm:$0xff] }
 0x13f   :  { %584 = vmatprep.subr.mxu1 %v507_v24  ;;  %v624_v24 = vld [vmem:[#allocation7 + $0x88] sm:$0xff] }
 0x140   :  { %585 = vmatpush2.msra.mxu1 %v506_v25  ;;  %v608_v25 = vld [vmem:[#allocation7 + $0x8] sm:$0xff] }
 0x141   :  { %586 = vmatprep.subr.mxu1 %v505_v26  ;;  %v623_v26 = vld [vmem:[#allocation7 + $0x80] sm:$0xff] }
 0x142   :  { %587 = vmatpush2.msra.mxu1 %v504_v27  ;;  %v607_v27 = vld [vmem:[#allocation7] sm:$0xff] }
 0x143   :  { %588 = vmatprep.subr.mxu1 %v503_v28  ;;  %v528_v28 = vsub.s32 2, %v911_v31 }
 0x144   :  { %589 = vmatpush2.msra.mxu1 %v502_v29 }
 0x145   :  { %590 = vmatprep.subr.mxu1 %v501_v43  ;;  %v529_v29 = vrot.slane %v917_v33, %v528_v28  ;;  %v533_v30 = vrot.slane %v922_v34, %v528_v28 }
 0x146   :  { %591 = vmatpush2.msra.mxu1 %v500_v44 }
 0x147   :  { %592 = vmatprep.subr.mxu1 %v499_v45 }
 0x148   :  { %593 = vmatpush2.msra.mxu1 %v498_v46 }
 0x149   :  { %594 = vmatprep.subr.mxu1 %v497_v47 }
 0x14a   :  { %595 = vmatpush2.msra.mxu1 %v496_v48 }
 0x14b   :  { %596 = vmatprep.subr.mxu1 %v495_v49 }
 0x14c   :  { %597 = vmatpush2.msra.mxu1 %v494_v50 }
 0x1cd   :  { %v308_v37 = vpop.f32.mrf.mxu1 }
 0x1ce   :  { %v309_v38 = vadd.f32 %v308_v37, %v237_v35 }
 0x1cf   :  { %v310_v39 = vpop.f32.mrf.mxu1 }
 0x1d0   :  { %v311_v40 = vadd.f32 %v310_v39, %v241_v36  ;;  %v313_v42 = vmax.f32 %v309_v38, 0.0 }
 0x1d2   :  { %v314_v41 = vmax.f32 %v311_v40, 0.0  ;;  %v641_v40 = vsub.s32 3, %v911_v31 }
 0x1d4   :  { %452 = vmatprep.mubr.f32.mxu0 %v314_v41 }
 0x1d5   :  { %453 = vmatmul.mubr.f32.vlgmr.msra.gmra.mxu0 %v313_v42  ;;  %v642_v42 = vrot.slane %v917_v33, %v641_v40 }
 0x1d6   :  { %731 = vmatpush3.msra.mxu0 %v622_v52 }
 0x1d7   :  { %732 = vmatprep.subr.mxu0 %v637_v53 }
 0x1d8   :  { %733 = vmatpush3.msra.mxu0 %v621_v54 }
 0x1d9   :  { %734 = vmatprep.subr.mxu0 %v636_v55 }
 0x1da   :  { %735 = vmatpush3.msra.mxu0 %v620_v56 }
 0x1db   :  { %736 = vmatprep.subr.mxu0 %v635_v57 }
 0x1dc   :  { %737 = vmatpush3.msra.mxu0 %v619_v58 }
 0x1dd   :  { %738 = vmatprep.subr.mxu0 %v634_v59 }
 0x1de   :  { %739 = vmatpush3.msra.mxu0 %v618_v60 }
 0x1df   :  { %740 = vmatprep.subr.mxu0 %v633_v61 }
 0x1e0   :  { %741 = vmatpush3.msra.mxu0 %v617_v62 }
 0x1e1   :  { %742 = vmatprep.subr.mxu0 %v632_v63 }
 0x1e2   :  { %743 = vmatpush3.msra.mxu0 %v616_v0 }
 0x1e3   :  { %744 = vmatprep.subr.mxu0 %v631_v1 }
 0x1e4   :  { %745 = vmatpush3.msra.mxu0 %v615_v2 }
 0x1e5   :  { %746 = vmatprep.subr.mxu0 %v630_v3 }
 0x1e6   :  { %747 = vmatpush3.msra.mxu0 %v614_v4 }
 0x1e7   :  { %748 = vmatprep.subr.mxu0 %v629_v5 }
 0x1e8   :  { %749 = vmatpush3.msra.mxu0 %v613_v6 }
 0x1e9   :  { %750 = vmatprep.subr.mxu0 %v628_v7 }
 0x1ea   :  { %751 = vmatpush3.msra.mxu0 %v612_v8 }
 0x1eb   :  { %752 = vmatprep.subr.mxu0 %v627_v9 }
 0x1ec   :  { %753 = vmatpush3.msra.mxu0 %v611_v10 }
 0x1ed   :  { %754 = vmatprep.subr.mxu0 %v626_v20 }
 0x1ee   :  { %755 = vmatpush3.msra.mxu0 %v610_v21 }
 0x1ef   :  { %756 = vmatprep.subr.mxu0 %v625_v22 }
 0x1f0   :  { %757 = vmatpush3.msra.mxu0 %v609_v23 }
 0x1f1   :  { %758 = vmatprep.subr.mxu0 %v624_v24 }
 0x1f2   :  { %759 = vmatpush3.msra.mxu0 %v608_v25 }
 0x1f3   :  { %760 = vmatprep.subr.mxu0 %v623_v26 }
 0x1f4   :  { %761 = vmatpush3.msra.mxu0 %v607_v27 }
 0x295   :  { %v454_v14 = vpop.f32.mrf.mxu0 }
 0x296   :  { %v455_v15 = vadd.f32 %v454_v14, %v383_v12 }
 0x297   :  { %v456_v16 = vpop.f32.mrf.mxu0 }
 0x298   :  { %v457_v17 = vadd.f32 %v456_v16, %v387_v13  ;;  %v459_v19 = vmax.f32 %v455_v15, 0.0 }
 0x29a   :  { %v460_v18 = vmax.f32 %v457_v17, 0.0 }
 0x29c   :  { %598 = vmatprep.mubr.f32.mxu1 %v460_v18 }
 0x29d   :  { %599 = vmatmul.mubr.f32.vlgmr.msra.gmra.mxu1 %v459_v19 }
 0x35d   :  { %v600_v32 = vpop.f32.mrf.mxu1 }
 0x35e   :  { %v601_v35 = vadd.f32 %v600_v32, %v529_v29 }
 0x35f   :  { %v602_v36 = vpop.f32.mrf.mxu1 }
 0x360   :  { %v603_v37 = vadd.f32 %v602_v36, %v533_v30  ;;  %v605_v39 = vmax.f32 %v601_v35, 0.0 }
 0x362   :  { %v606_v38 = vmax.f32 %v603_v37, 0.0 }
 0x364   :  { %707 = vmatprep.mubr.f32.mxu0 %v606_v38 }
 0x365   :  { %708 = vmatmul.mubr.f32.vlgmr.msra.gmra.mxu0 %v605_v39 }
 0x425   :  { %v762_v41 = vpop.f32.mrf.mxu0 }
 0x427   :  { %v763_v43 = vpop.f32.mrf.mxu0 }
 0x428   :  { %v764_v44 = vadd.f32 %v763_v43, %v762_v41 }
 0x42a   :  { %v710_v45 = vadd.f32 %v764_v44, %v642_v42 }
 0x42c   :  { %713 = vst [vmem:[#allocation8] sm:$0xff] %v710_v45 }
 0x42d   :  { %845 = shalt.err (!%p842_p5)
}
 0x42e   :  { %723 = dma.vmem_to_hbm [thread:$0]  %s721_s14, 128, %s942_s5, [#allocation4]  }
 0x42f   :  { %858 = dma.done.wait [#allocation4], 128  }
 0x430   :  { %859 = vsyncadd [#allocation4], 4294967168 }
 0x431   :  { %727 = vsyncpa [#allocation3], 1 }
 0x432   :  { %728 = vsyncpa [#allocation6], 1 }
 0x433   :  { %729 = vsyncpa [#allocation4], 1 }

</bundles_post_ra>
